<compile_context>
chip_gen: v5e
topology: v5e:2x2
jax: 0.10.0
libtpu: 0.0.40
codegen_flags: <defaults>
</compile_context>

<pallas_src>
import jax
import jax.numpy as jnp
from jax.experimental import pallas as pl
from jax.experimental.pallas import tpu as pltpu


def _cat_attention_kernel(x_ref, xc_ref, w1x_ref, w1c_ref, w2_ref, out_ref):
    # Per-batch block: x_ref / xc_ref / out_ref are (C, S); weights resident.
    x = x_ref[...].astype(jnp.float32)       # (C, S)
    xc = xc_ref[...].astype(jnp.float32)     # (C, S)

    # AdaptiveAvgPool2d(1): 1/S is pre-folded into w1x/w1c, so plain lane sums.
    sum_x = jnp.sum(x, axis=-1, keepdims=True)     # (C, 1)
    sum_xc = jnp.sum(xc, axis=-1, keepdims=True)   # (C, 1)

    # Linear(2C -> hidden, bias=False) on concat([mean_x, mean_xc]) as two
    # VPU broadcast-muls + sublane reduces (channel concat folded into the
    # split weights; no MXU involvement).
    h = (jnp.sum(sum_x * w1x_ref[...], axis=0, keepdims=True)
         + jnp.sum(sum_xc * w1c_ref[...], axis=0, keepdims=True))   # (1, hidden)
    h = jnp.maximum(h, 0.0)                                         # ReLU

    # Linear(hidden -> C, bias=False) + Sigmoid ('basic' mode), again as a
    # lane-reduce GEMV against w2 stored in (C, hidden) layout.
    att = jax.nn.sigmoid(
        jnp.sum(h * w2_ref[...], axis=-1, keepdims=True))           # (C, 1)

    # x * y.expand_as(x) + x_cat
    out_ref[...] = (x * att + xc).astype(out_ref.dtype)


@jax.jit
def cat_attention(x, x_cat, w1, w2):
    """x, x_cat: (B, C, H, W).  w1: (2C, hidden), w2: (hidden, C) — stored as
    (in_features, out_features), i.e. already transposed vs PyTorch nn.Linear."""
    b, c, h, w = x.shape
    s = h * w
    hidden = w1.shape[1]

    x_f = x.reshape(b, c, s)
    xc_f = x_cat.reshape(b, c, s)

    # Fold the 1/(H*W) of the mean into the first-layer weights (wrapper-side,
    # one-time) and split W1 so the channel concat disappears.
    inv_s = jnp.float32(1.0 / s)
    w1x = (w1[:c] * inv_s).astype(jnp.float32)   # rows multiplying mean(x)
    w1c = (w1[c:] * inv_s).astype(jnp.float32)   # rows multiplying mean(x_cat)
    w2t = jnp.transpose(w2).astype(jnp.float32)  # (C, hidden): transpose-free GEMV

    # Per-step VMEM budget: double-buffered x / x_cat / out slabs + resident
    # weights + slack.  Cap at 48 MiB so it is valid on v7x's 64 MiB VMEM while
    # still raising v5e's 16 MiB scoped default.
    slab = c * s * x.dtype.itemsize
    wbytes = (w1x.size + w1c.size + w2t.size) * 4
    vmem_limit = int(min(max(6 * slab + 2 * wbytes + (4 << 20), 32 << 20),
                         48 << 20))

    def act_spec():
        # (1, C, S) block per batch; leading dim squeezed out of the kernel ref.
        return pl.BlockSpec((None, c, s), lambda i: (i, 0, 0))

    def weight_spec(shape):
        # Constant index map -> stays resident in VMEM across the grid.
        return pl.BlockSpec(shape, lambda i: (0, 0))

    out = pl.pallas_call(
        _cat_attention_kernel,
        out_shape=jax.ShapeDtypeStruct((b, c, s), x.dtype),
        grid=(b,),
        in_specs=[
            act_spec(),                    # x
            act_spec(),                    # x_cat
            weight_spec((c, hidden)),      # w1x (pre-scaled by 1/S)
            weight_spec((c, hidden)),      # w1c (pre-scaled by 1/S)
            weight_spec((c, hidden)),      # w2 in (C, hidden) layout
        ],
        out_specs=act_spec(),
        compiler_params=pltpu.CompilerParams(
            dimension_semantics=("parallel",),
            vmem_limit_bytes=vmem_limit),
    )(x_f, xc_f, w1x, w1c, w2t)
    return out.reshape(b, c, h, w)


def _reference(x, x_cat, w1, w2):
    """Pure-JAX reference mirroring the PyTorch forward."""
    cat_in = jnp.concatenate([x, x_cat], axis=1)          # (B, 2C, H, W)
    y = jnp.mean(cat_in, axis=(2, 3))                     # (B, 2C)
    y = jnp.maximum(y @ w1, 0.0)                          # (B, hidden)
    y = jax.nn.sigmoid(y @ w2)                            # (B, C)
    return x * y[:, :, None, None] + x_cat


if __name__ == "__main__":
    # Module config: in_c = 2*C (channels of the concatenated input),
    # out_c = C, reduction = 4, mode = 'basic'.
    B, C, H, W = 2, 4, 16, 16
    in_c = 2 * C
    reduction = 4
    hidden = in_c // reduction
    out_c = C

    key = jax.random.PRNGKey(0)
    kx, kxc, kw1, kw2 = jax.random.split(key, 4)
    x = jax.random.normal(kx, (B, C, H, W), dtype=jnp.float32)
    x_cat = jax.random.normal(kxc, (B, C, H, W), dtype=jnp.float32)
    # Deterministic SE weights, stored (in_features, out_features).
    w1 = 0.1 * jax.random.normal(kw1, (in_c, hidden), dtype=jnp.float32)
    w2 = 0.1 * jax.random.normal(kw2, (hidden, out_c), dtype=jnp.float32)

    out = cat_attention(x, x_cat, w1, w2)
    out = jax.block_until_ready(out)

    ref = _reference(x, x_cat, w1, w2)
    assert out.shape == (B, C, H, W)
    assert jnp.allclose(out, ref, atol=1e-5, rtol=1e-5), "mismatch vs reference"

    print("KERNEL_OK")
</pallas_src>

<mosaic_0001>
module attributes {stable_mosaic.version = 11 : i64} {
  func.func @_cat_attention_kernel(%arg0: i32, %arg1: memref<1x4x256xf32, #tpu.memory_space<vmem>>, %arg2: memref<1x4x256xf32, #tpu.memory_space<vmem>>, %arg3: memref<4x2xf32, #tpu.memory_space<vmem>>, %arg4: memref<4x2xf32, #tpu.memory_space<vmem>>, %arg5: memref<4x2xf32, #tpu.memory_space<vmem>>, %arg6: memref<1x4x256xf32, #tpu.memory_space<vmem>>) attributes {dimension_semantics = [#tpu.dimension_semantics<parallel>], iteration_bounds = array<i64: 2>, scalar_prefetch = 0 : i64, scratch_operands = 0 : i64, tpu.core_type = #tpu.core_type<tc>, window_params = [{transform_indices = @transform_0, window_bounds = array<i64: 1, 4, 256>}, {transform_indices = @transform_1, window_bounds = array<i64: 1, 4, 256>}, {pipeline_mode = #tpu.pipeline_mode<synchronous>, transform_indices = @transform_2, window_bounds = array<i64: 4, 2>}, {pipeline_mode = #tpu.pipeline_mode<synchronous>, transform_indices = @transform_3, window_bounds = array<i64: 4, 2>}, {pipeline_mode = #tpu.pipeline_mode<synchronous>, transform_indices = @transform_4, window_bounds = array<i64: 4, 2>}, {transform_indices = @transform_5, window_bounds = array<i64: 1, 4, 256>}]} {
    %c0 = arith.constant 0 : index
    %c0_0 = arith.constant 0 : index
    %c0_1 = arith.constant 0 : index
    %0 = vector.load %arg1[%c0, %c0_0, %c0_1] : memref<1x4x256xf32, #tpu.memory_space<vmem>>, vector<1x4x256xf32>
    %1 = vector.shape_cast %0 : vector<1x4x256xf32> to vector<4x256xf32>
    %c0_2 = arith.constant 0 : index
    %c0_3 = arith.constant 0 : index
    %c0_4 = arith.constant 0 : index
    %2 = vector.load %arg2[%c0_2, %c0_3, %c0_4] : memref<1x4x256xf32, #tpu.memory_space<vmem>>, vector<1x4x256xf32>
    %3 = vector.shape_cast %2 : vector<1x4x256xf32> to vector<4x256xf32>
    %cst = arith.constant dense<0.000000e+00> : vector<4xf32>
    %4 = vector.multi_reduction <add>, %1, %cst [1] : vector<4x256xf32> to vector<4xf32>
    %5 = vector.shape_cast %4 : vector<4xf32> to vector<4x1xf32>
    %cst_5 = arith.constant dense<0.000000e+00> : vector<4xf32>
    %6 = vector.multi_reduction <add>, %3, %cst_5 [1] : vector<4x256xf32> to vector<4xf32>
    %7 = vector.shape_cast %6 : vector<4xf32> to vector<4x1xf32>
    %c0_6 = arith.constant 0 : index
    %c0_7 = arith.constant 0 : index
    %8 = vector.load %arg3[%c0_6, %c0_7] : memref<4x2xf32, #tpu.memory_space<vmem>>, vector<4x2xf32>
    %9 = vector.broadcast %5 : vector<4x1xf32> to vector<4x2xf32>
    %10 = arith.mulf %9, %8 : vector<4x2xf32>
    %cst_8 = arith.constant dense<0.000000e+00> : vector<2xf32>
    %11 = vector.multi_reduction <add>, %10, %cst_8 [0] : vector<4x2xf32> to vector<2xf32>
    %12 = vector.shape_cast %11 : vector<2xf32> to vector<1x2xf32>
    %c0_9 = arith.constant 0 : index
    %c0_10 = arith.constant 0 : index
    %13 = vector.load %arg4[%c0_9, %c0_10] : memref<4x2xf32, #tpu.memory_space<vmem>>, vector<4x2xf32>
    %14 = vector.broadcast %7 : vector<4x1xf32> to vector<4x2xf32>
    %15 = arith.mulf %14, %13 : vector<4x2xf32>
    %cst_11 = arith.constant dense<0.000000e+00> : vector<2xf32>
    %16 = vector.multi_reduction <add>, %15, %cst_11 [0] : vector<4x2xf32> to vector<2xf32>
    %17 = vector.shape_cast %16 : vector<2xf32> to vector<1x2xf32>
    %18 = arith.addf %12, %17 : vector<1x2xf32>
    %cst_12 = arith.constant 0.000000e+00 : f32
    %19 = vector.broadcast %cst_12 : f32 to vector<1x2xf32>
    %20 = arith.maximumf %18, %19 : vector<1x2xf32>
    %c0_13 = arith.constant 0 : index
    %c0_14 = arith.constant 0 : index
    %21 = vector.load %arg5[%c0_13, %c0_14] : memref<4x2xf32, #tpu.memory_space<vmem>>, vector<4x2xf32>
    %22 = vector.broadcast %20 : vector<1x2xf32> to vector<4x2xf32>
    %23 = arith.mulf %22, %21 : vector<4x2xf32>
    %cst_15 = arith.constant dense<0.000000e+00> : vector<4xf32>
    %24 = vector.multi_reduction <add>, %23, %cst_15 [1] : vector<4x2xf32> to vector<4xf32>
    %25 = vector.shape_cast %24 : vector<4xf32> to vector<4x1xf32>
    %26 = arith.negf %25 : vector<4x1xf32>
    %27 = math.exp %26 : vector<4x1xf32>
    %cst_16 = arith.constant 1.000000e+00 : f32
    %28 = vector.broadcast %cst_16 : f32 to vector<4x1xf32>
    %29 = arith.addf %28, %27 : vector<4x1xf32>
    %30 = arith.divf %28, %29 : vector<4x1xf32>
    %31 = vector.broadcast %30 : vector<4x1xf32> to vector<4x256xf32>
    %32 = arith.mulf %1, %31 : vector<4x256xf32>
    %33 = arith.addf %32, %3 : vector<4x256xf32>
    %c0_17 = arith.constant 0 : index
    %c0_18 = arith.constant 0 : index
    %c0_19 = arith.constant 0 : index
    %34 = vector.load %arg6[%c0_17, %c0_18, %c0_19] : memref<1x4x256xf32, #tpu.memory_space<vmem>>, vector<1x4x256xf32>
    %35 = vector.shape_cast %34 : vector<1x4x256xf32> to vector<4x256xf32>
    %36 = vector.shape_cast %33 : vector<4x256xf32> to vector<1x4x256xf32>
    tpu.vector_store %arg6[%c0_17, %c0_18, %c0_19], %36 {strides = array<i32>} : memref<1x4x256xf32, #tpu.memory_space<vmem>>, vector<1x4x256xf32>,
    return
  }
  func.func @transform_0(%arg0: i32) -> (i32, i32, i32) {
    %c0_i32 = arith.constant 0 : i32
    %c0_i32_0 = arith.constant 0 : i32
    %c0_i32_1 = arith.constant 0 : i32
    return %arg0, %c0_i32, %c0_i32_0 : i32, i32, i32
  }
  func.func @transform_1(%arg0: i32) -> (i32, i32, i32) {
    %c0_i32 = arith.constant 0 : i32
    %c0_i32_0 = arith.constant 0 : i32
    %c0_i32_1 = arith.constant 0 : i32
    return %arg0, %c0_i32, %c0_i32_0 : i32, i32, i32
  }
  func.func @transform_2(%arg0: i32) -> (i32, i32) {
    %c0_i32 = arith.constant 0 : i32
    %c0_i32_0 = arith.constant 0 : i32
    %c0_i32_1 = arith.constant 0 : i32
    return %c0_i32, %c0_i32_0 : i32, i32
  }
  func.func @transform_3(%arg0: i32) -> (i32, i32) {
    %c0_i32 = arith.constant 0 : i32
    %c0_i32_0 = arith.constant 0 : i32
    %c0_i32_1 = arith.constant 0 : i32
    return %c0_i32, %c0_i32_0 : i32, i32
  }
  func.func @transform_4(%arg0: i32) -> (i32, i32) {
    %c0_i32 = arith.constant 0 : i32
    %c0_i32_0 = arith.constant 0 : i32
    %c0_i32_1 = arith.constant 0 : i32
    return %c0_i32, %c0_i32_0 : i32, i32
  }
  func.func @transform_5(%arg0: i32) -> (i32, i32, i32) {
    %c0_i32 = arith.constant 0 : i32
    %c0_i32_0 = arith.constant 0 : i32
    %c0_i32_1 = arith.constant 0 : i32
    return %arg0, %c0_i32, %c0_i32_0 : i32, i32, i32
  }
}

</mosaic_0001>

<bundles_post_ra>
// kernel: cat_attention.1
= control target key start
LH: loop header
LB: loop body
LE: loop exit
PB: predicated region body
PF: predicated region fallthrough
CT: control target
= control target key end

     0   :  { %s460_s18 = smov 0   ;;  %s505_s0 = inlined_call_operand.vmem [shape: f32[2,4,256], index: 0, kind: input, shape index: {}]   ;;  %s506_s1 = inlined_call_operand.vmem [shape: f32[2,4,256], index: 1, kind: input, shape index: {}]   ;;  %s507_s2 = inlined_call_operand.vmem [shape: f32[4,2], index: 2, kind: input, shape index: {}]   ;;  %s508_s3 = inlined_call_operand.vmem [shape: f32[4,2], index: 3, kind: input, shape index: {}]   ;;  %s509_s4 = inlined_call_operand.vmem [shape: f32[4,2], index: 4, kind: input, shape index: {}]   ;;  %s510_s5 = inlined_call_operand.vmem [shape: f32[2,4,256], index: 5, kind: output, shape index: {}]  }
   0x1 LB: > { %s391_s19 = sadd.s32 4294967295, %s427_s18   ;;  %p395_p0 = scmp.ge.s32.totalorder %s427_s18, 1  ;;  %s427_s18 = sphi %s460_s18, %s15_s18  }
   0x2   : > { %p197_p1 = scmp.lt.s32.totalorder %s427_s18, 3 }
   0x4   : > { %p198_p2 = pnand %p395_p0, %p197_p1 }
   0x5   : > { %p230_p3 = scmp.lt.s32.totalorder (!%p198_p2), %s391_s19, 1 }
   0x6   : > { %201 = sbr.rel (%p198_p2) target bundleno = 323 (0x143), region = 40 }
   0xb   : > { %s512_s19 = smov (!%p230_p3, %s391_s19), 1  ;;  %vm253_vm0 = vcmask 1043456   ;;  %v270_v12 = vld [vmem:[%s507_s2] sm:$0xf]  ;;  %vm272_vm1 = vcmask 11264  }
   0xc   : > { %s468_s20 = sshll.u32 %s512_s19, 3  ;;  %v280_v17 = vld [vmem:[%s508_s3] sm:$0xf]  ;;  %v429_v43 = vmov 839922192  }
   0xd   : > { %s234_s23 = scalar_lea.vmem %s505_s0, %s468_s20  ;;  %s239_s26 = scalar_lea.vmem %s506_s1, %s468_s20  ;;  %v291_v33 = vld [vmem:[%s509_s4] sm:$0xf]  ;;  %v317_v44 = vunpack.c.l.s4 %v429_v43 }
   0xe   : > { %v474_v0 = vld [vmem:[%s234_s23] sm:$0xff]  ;;  %s244_s10 = scalar_lea.vmem %s510_s5, %s468_s20 }
   0xf   : > { %248 = vst [vmem:[#allocation1] ss:$2 sm:$0xff] %v474_v0  ;;  %v481_v1 = vld [vmem:[%s239_s26] sm:$0xff]  ;;  %v318_v49 = vunpack.c.0.s8 %v317_v44 }
  0x16   : > { %v249_v2 = vld.sshfl [vmem:[#allocation1] sm:$0xff pattern:$0x75316420]  ;;  %v250_v3 = vld.sshfl [vmem:[#allocation1 + $0x8] sm:$0xff pattern:$0x75316420] }
  0x17   : > { %v254_v4 = vsel %vm253_vm0, %v249_v2, 0.0  ;;  %v255_v5 = vsel %vm253_vm0, %v250_v3, 0.0  ;;  %260 = vst [vmem:[#allocation1] ss:$2 sm:$0xff] %v481_v1 }
  0x18   : > { %v256_v6 = vadd.f32 %v255_v5, %v254_v4 }
  0x1a   : > { %257 = vadd.xlane.f32.xlu0 %v256_v6 }
  0x1e   : > { %v261_v7 = vld.sshfl [vmem:[#allocation1] sm:$0xff pattern:$0x75316420]  ;;  %v262_v8 = vld.sshfl [vmem:[#allocation1 + $0x8] sm:$0xff pattern:$0x75316420] }
  0x1f   : > { %v265_v9 = vsel %vm253_vm0, %v261_v7, 0.0  ;;  %v266_v10 = vsel %vm253_vm0, %v262_v8, 0.0 }
  0x20   : > { %v267_v11 = vadd.f32 %v266_v10, %v265_v9 }
  0x22   : > { %268 = vadd.xlane.f32.xlu0 %v267_v11 }
  0x8d   : > { %v258_v13 = vpop.xlane.xlu0 %257 }
  0x8e   : > { %v271_v14 = vmul.f32 %v270_v12, %v258_v13 }
  0x90   : > { %v273_v15 = vsel %vm272_vm1, %v271_v14, 0.0 }
  0x91   : > { %v274_v16 = vrot.slane %v273_v15, 4 }
  0x93   : > { %v275_v18 = vadd.f32 %v274_v16, %v273_v15 }
  0x95   : > { %v269_v19 = vpop.xlane.xlu0 %268  ;;  %v276_v21 = vrot.slane %v275_v18, 2 }
  0x96   : > { %v281_v20 = vmul.f32 %v280_v17, %v269_v19 }
  0x97   : > { %v277_v24 = vadd.f32 %v276_v21, %v275_v18 }
  0x98   : > { %v282_v22 = vsel %vm272_vm1, %v281_v20, 0.0 }
  0x99   : > { %v283_v23 = vrot.slane %v282_v22, 4  ;;  %v278_v27 = vrot.slane %v277_v24, 1 }
  0x9b   : > { %v284_v25 = vadd.f32 %v283_v23, %v282_v22  ;;  %v279_v30 = vadd.f32 %v278_v27, %v277_v24 }
  0x9d   : > { %v285_v26 = vrot.slane %v284_v25, 2 }
  0x9f   : > { %v286_v28 = vadd.f32 %v285_v26, %v284_v25 }
  0xa1   : > { %v287_v29 = vrot.slane %v286_v28, 1 }
  0xa3   : > { %v288_v31 = vadd.f32 %v287_v29, %v286_v28 }
  0xa5   : > { %v289_v32 = vadd.f32 %v288_v31, %v279_v30 }
  0xa7   : > { %v290_v34 = vmax.f32 %v289_v32, 0.0 }
  0xa9   : > { %v292_v35 = vmul.f32 %v291_v33, %v290_v34 }
  0xab   : > { %v293_v36 = vsel %vm272_vm1, %v292_v35, 0.0 }
  0xac   : > { %294 = vadd.xlane.f32.xlu1 %v293_v36 }
 0x11f   : > { %v295_v37 = vpop.xlane.xlu1 %294 }
 0x120   : > { %v402_v38 = vmul.f32 -1.442695, %v295_v37 }
 0x122   : > { %417 = vpow2.f32 %v402_v38 }
 0x128   : > { %v418_v39 = vpop.eup %417 }
 0x129   : > { %v299_v40 = vadd.f32 1.0, %v418_v39 }
 0x12b   : > { %419 = vrcp.f32 %v299_v40  ;;  %v311_v46 = vand.u32 2147483648, %v299_v40  ;;  %v309_v48 = vand.u32 2147483647, %v299_v40  ;;  %vm305_vm3 = vweird.f32 %v299_v40 }
 0x12d   : > { %v312_v51 = vor.u32 1.1754944e-38, %v311_v46  ;;  %vm310_vm5 = vcmp.eq.f32.partialorder %v309_v48, 8.507059e+37 }
 0x131   : > { %v420_v41 = vpop.eup %419 }
 0x132   : > { %v301_v42 = vmul.f32 %v420_v41, %v299_v40  ;;  %vm306_vm2 = vweird.f32 %v420_v41 }
 0x133   : > { %vm307_vm4 = vmor %vm305_vm3, %vm306_vm2 }
 0x134   : > { %v302_v45 = vsub.f32 1.0, %v301_v42 }
 0x136   : > { %v303_v47 = vmul.f32 %v420_v41, %v302_v45 }
 0x138   : > { %v304_v50 = vadd.f32 %v420_v41, %v303_v47 }
 0x13a   : > { %v308_v52 = vsel %vm307_vm4, %v420_v41, %v304_v50 }
 0x13b   : > { %v313_v53 = vsel %vm310_vm5, %v312_v51, %v308_v52 }
 0x13c   : > { %v319_v54 = vperm.slane %v313_v53, %v318_v49 }
 0x13e   : > { %v321_v55 = vmul.f32 %v319_v54, %v474_v0 }
 0x140   : > { %v322_v56 = vadd.f32 %v321_v55, %v481_v1 }
 0x142   : > { %323 = vst [vmem:[%s244_s10] sm:$0xff] %v322_v56 }
 0x143 PF: > { %s15_s18 = sadd.s32 1, %s427_s18  }
 0x144   : > { %p12_p4 = scmp.ge.s32.totalorder %s15_s18, 4  }
 0x146   :  { %14 = sbr.rel (!%p12_p4) target bundleno = 1 (0x1), region = 73 }

</bundles_post_ra>
